<compile_context>
chip_gen: v6e
topology: v6e:2x2x1
jax: 0.10.0
libtpu: 0.0.40
codegen_flags: <defaults>
</compile_context>

<pallas_src>
import jax
import jax.numpy as jnp
from jax.experimental import pallas as pl
from jax.experimental.pallas import tpu as pltpu


def _gin_kernel(eps_ref, x_ref, src_ref, idx_ref, w_ref, b_ref, o_ref, acc_ref):
    # eps_ref: SMEM (1,)             learnable eps scalar
    # x_ref:   VMEM (1, Cin, TN)     target node features (channels-first tile)
    # src_ref: VMEM (1, Cin, TM)     gather-source chunk (== slice of x when y is None)
    # idx_ref: VMEM (1, K, TN)       neighbor indices into [0, M), node axis on lanes
    # w_ref:   VMEM (Cout, Cin)      1x1 conv weight
    # b_ref:   VMEM (Cout, 1)        conv bias
    # o_ref:   VMEM (1, Cout, TN)
    # acc_ref: VMEM (Cin, TN) f32    x_j accumulator across the M grid axis
    m_i = pl.program_id(2)
    num_m = pl.num_programs(2)

    @pl.when(m_i == 0)
    def _():
        acc_ref[...] = jnp.zeros_like(acc_ref)

    src = src_ref[0]                               # (Cin, TM)
    idx = idx_ref[0]                               # (K, TN) int32
    k_steps = idx.shape[0]
    tm = src.shape[1]
    tn = idx.shape[1]

    # Shift indices into chunk-local coordinates; iota is only (TM, TN) so vreg/VMEM
    # pressure is independent of the graph size M.
    idx_local = idx - m_i * tm                     # (K, TN) int32
    iota_tm = jax.lax.broadcasted_iota(jnp.int32, (tm, tn), 0)

    # Adjacency chunk: K-step accumulation of (TM, TN) one-hots, kept in the 32-bit
    # (f32) VALU domain; a single cast to the MXU operand dtype per chunk.
    # Counts <= K: exact in bf16 for K <= 256 (asserted in the wrapper).
    adj_f32 = jnp.zeros((tm, tn), jnp.float32)
    for k in range(k_steps):                       # K is static -> fully unrolled
        adj_f32 = adj_f32 + (iota_tm == idx_local[k:k + 1, :]).astype(jnp.float32)
    adj_t = adj_f32.astype(src.dtype)

    # Neighbor-sum partial: x_j[c, n] += sum_{m in chunk} src[c, m] * A^T[m, n]
    acc_ref[...] += jnp.dot(src, adj_t, preferred_element_type=jnp.float32)

    @pl.when(m_i == num_m - 1)
    def _():
        eps = eps_ref[0]
        x = x_ref[0]                                                    # (Cin, TN)
        h = (1.0 + eps) * x.astype(jnp.float32) + acc_ref[...]          # (Cin, TN) f32
        # 1x1 conv == channel matmul, then bias + ReLU (BasicConv act='relu', norm=None).
        # NOTE: h is cast to the weight dtype for the MXU; with bf16 weights this is a
        # deliberate mixed-precision trade-off (accumulation stays f32).
        out = jnp.dot(w_ref[...], h.astype(w_ref.dtype),
                      preferred_element_type=jnp.float32)               # (Cout, TN)
        out = out + b_ref[...].astype(jnp.float32)                      # (Cout, 1) bcast
        o_ref[0] = jnp.maximum(out, 0.0).astype(o_ref.dtype)


def _round_up(v, m):
    return (v + m - 1) // m * m


def _tpu_vmem_capacity_bytes():
    try:
        return int(pltpu.get_tpu_info().vmem_capacity_bytes)
    except Exception:
        return 64 * 1024 * 1024     # conservative default (v7x-sized VMEM)


def gin_conv2d(x, edge_index, weight, bias, eps, y=None):
    """x: (B, Cin, N, 1) NCHW; edge_index: (2, B, N, K); weight: (Cout, Cin, 1, 1);
    bias: (Cout,); eps: (1,). Returns (B, Cout, N, 1)."""
    B, Cin, N, _ = x.shape
    Cout = weight.shape[0]
    src_nchw = x if y is None else y
    M = src_nchw.shape[2]

    # Channels-first kernel layout: only cheap squeezes, no feature-tensor transposes.
    x_cn = x[..., 0]                                                 # (B, Cin, N)
    src_cm = src_nchw[..., 0]                                        # (B, Cin, M)
    # Indices are tiny; transpose so the (long) node axis is the lane axis.
    idx_kn = jnp.transpose(edge_index[0].astype(jnp.int32), (0, 2, 1))   # (B, K, N)
    K = idx_kn.shape[1]
    w2 = weight.reshape(Cout, Cin)
    b2 = bias.reshape(Cout, 1)
    eps1 = eps.reshape(1).astype(jnp.float32)

    # 16-bit adjacency counts are exact only up to 256.
    if jnp.dtype(x.dtype).itemsize < 4:
        assert K <= 256, "fan-in K > 256 not exact with 16-bit MXU operands"

    # Generation-aware VMEM budget / tile sizes.
    vmem_cap = _tpu_vmem_capacity_bytes()
    big_vmem = vmem_cap >= 96 * 1024 * 1024          # v5e/v6e (128 MiB) vs v7x (64 MiB)
    vmem_limit = max(32 * 1024 * 1024,
                     min(vmem_cap - 16 * 1024 * 1024, 100 * 1024 * 1024))

    # Node-axis tile TN (lane axis): pad N to a multiple of 128 -> lane-dense stores.
    N_pad = _round_up(N, 128)
    TN = 128
    for t in ((512, 256, 128) if big_vmem else (256, 128)):
        if N_pad % t == 0:
            TN = t
            break
    # v7x megacore: with B == 1 make sure the parallel grid has >= 2 steps if possible.
    if B == 1:
        while TN > 128 and (N_pad // TN) < 2:
            TN //= 2

    # Gather-source chunk TM (reduction axis): multiple of 128, bounded padding waste.
    tm_target = 2048 if big_vmem else 1024
    TM = min(tm_target, _round_up(M, 128))
    while TM > 128 and (_round_up(M, TM) - M) > TM // 2:
        TM //= 2
    M_pad = _round_up(M, TM)

    # Zero-pad.  Padded idx columns read index 0 (valid); padded output columns are
    # sliced off below.  Padded src columns are never referenced (all idx < M) and are
    # zero anyway, so the M-reduction is exact.
    if N_pad != N:
        x_cn = jnp.pad(x_cn, ((0, 0), (0, 0), (0, N_pad - N)))
        idx_kn = jnp.pad(idx_kn, ((0, 0), (0, 0), (0, N_pad - N)))
    if M_pad != M:
        src_cm = jnp.pad(src_cm, ((0, 0), (0, 0), (0, M_pad - M)))

    grid = (B, N_pad // TN, M_pad // TM)

    # TODO(synk): when Cout < Cin it is cheaper to pre-project W @ src per batch and do
    # a single (Cout, TM) @ (TM, TN) matmul; only worthwhile once MXU-bound.

    out_cn = pl.pallas_call(
        _gin_kernel,
        out_shape=jax.ShapeDtypeStruct((B, Cout, N_pad), x.dtype),
        grid=grid,
        in_specs=[
            pl.BlockSpec(memory_space=pltpu.MemorySpace.SMEM),              # eps
            pl.BlockSpec((1, Cin, TN), lambda b, n, m: (b, 0, n)),          # x tile
            pl.BlockSpec((1, Cin, TM), lambda b, n, m: (b, 0, m)),          # src chunk
            pl.BlockSpec((1, K, TN), lambda b, n, m: (b, 0, n)),            # idx tile
            pl.BlockSpec((Cout, Cin), lambda b, n, m: (0, 0)),              # W
            pl.BlockSpec((Cout, 1), lambda b, n, m: (0, 0)),                # bias
        ],
        out_specs=pl.BlockSpec((1, Cout, TN), lambda b, n, m: (b, 0, n)),
        scratch_shapes=[pltpu.VMEM((Cin, TN), jnp.float32)],                # x_j acc
        compiler_params=pltpu.CompilerParams(
            dimension_semantics=("parallel", "parallel", "arbitrary"),
            vmem_limit_bytes=int(vmem_limit),
        ),
    )(eps1, x_cn, src_cm, idx_kn, w2, b2)

    if N_pad != N:
        out_cn = out_cn[:, :, :N]
    return out_cn[..., None]                                         # (B, Cout, N, 1)


def _reference(x, edge_index, weight, bias, eps, y=None):
    # Pure-JAX reference mirroring the PyTorch forward.
    src = x if y is None else y
    idx = edge_index[0]                                              # (B, N, K)
    src3 = src[..., 0]                                               # (B, C, M)
    x_j = jax.vmap(lambda s, i: s[:, i])(src3, idx)                  # (B, C, N, K)
    x_j = jnp.sum(x_j, axis=-1, keepdims=True)                       # (B, C, N, 1)
    h = (1.0 + eps[0]) * x + x_j
    Cout, Cin = weight.shape[:2]
    out = jnp.einsum("oc,bcnw->bonw", weight.reshape(Cout, Cin), h) \
        + bias.reshape(1, Cout, 1, 1)
    return jnp.maximum(out, 0.0)


if __name__ == "__main__":
    key = jax.random.PRNGKey(0)
    k_x, k_idx, k_w, k_b, k_y, k_idx2 = jax.random.split(key, 6)

    B, Cin, Cout, N, K = 2, 16, 32, 16, 8

    x = jax.random.normal(k_x, (B, Cin, N, 1), dtype=jnp.float32)
    # edge_index[0]: neighbor indices (B, N, K); edge_index[1] unused in forward.
    nbr = jax.random.randint(k_idx, (B, N, K), 0, N, dtype=jnp.int32)
    ctr = jnp.broadcast_to(jnp.arange(N, dtype=jnp.int32)[None, :, None], (B, N, K))
    edge_index = jnp.stack([nbr, ctr], axis=0)                        # (2, B, N, K)

    # Deterministic parameter init (Conv2d(Cin, Cout, 1, bias=True); eps_init = 0.0).
    weight = jax.random.normal(k_w, (Cout, Cin, 1, 1), dtype=jnp.float32) * (1.0 / jnp.sqrt(Cin))
    bias = jax.random.normal(k_b, (Cout,), dtype=jnp.float32) * 0.1
    eps = jnp.array([0.0], dtype=jnp.float32)

    # TODO(synk): BasicConv norms other than None and acts other than ReLU are not
    # implemented (module here is constructed with act='relu', norm=None).

    # Case 1: y is None (self-gather).
    out = gin_conv2d(x, edge_index, weight, bias, eps)
    out = jax.block_until_ready(out)
    ref = _reference(x, edge_index, weight, bias, eps)
    assert out.shape == (B, Cout, N, 1)
    assert jnp.allclose(out, ref, rtol=1e-5, atol=1e-5), "mismatch vs JAX reference"

    # Case 2: explicit y with M != N (exercises the M-tiling / padding path).
    M2 = 24
    y_feat = jax.random.normal(k_y, (B, Cin, M2, 1), dtype=jnp.float32)
    nbr2 = jax.random.randint(k_idx2, (B, N, K), 0, M2, dtype=jnp.int32)
    edge_index2 = jnp.stack([nbr2, ctr], axis=0)
    out2 = gin_conv2d(x, edge_index2, weight, bias, eps, y=y_feat)
    out2 = jax.block_until_ready(out2)
    ref2 = _reference(x, edge_index2, weight, bias, eps, y=y_feat)
    assert jnp.allclose(out2, ref2, rtol=1e-5, atol=1e-5), "mismatch vs JAX reference (y path)"

    print("KERNEL_OK")
</pallas_src>

<mosaic_0001>
module attributes {stable_mosaic.version = 11 : i64} {
  func.func @_gin_kernel(%arg0: i32, %arg1: i32, %arg2: i32, %arg3: memref<1xf32, #tpu.memory_space<smem>>, %arg4: memref<1x16x128xf32, #tpu.memory_space<vmem>>, %arg5: memref<1x16x128xf32, #tpu.memory_space<vmem>>, %arg6: memref<1x8x128xi32, #tpu.memory_space<vmem>>, %arg7: memref<32x16xf32, #tpu.memory_space<vmem>>, %arg8: memref<32x1xf32, #tpu.memory_space<vmem>>, %arg9: memref<1x32x128xf32, #tpu.memory_space<vmem>>, %arg10: memref<16x128xf32, #tpu.memory_space<vmem>>) attributes {dimension_semantics = [#tpu.dimension_semantics<parallel>, #tpu.dimension_semantics<parallel>, #tpu.dimension_semantics<arbitrary>], iteration_bounds = array<i64: 2, 1, 1>, scalar_prefetch = 0 : i64, scratch_operands = 1 : i64, tpu.core_type = #tpu.core_type<tc>, window_params = [{transform_indices = @transform_0, window_bounds = array<i64: 1>}, {transform_indices = @transform_1, window_bounds = array<i64: 1, 16, 128>}, {transform_indices = @transform_2, window_bounds = array<i64: 1, 16, 128>}, {transform_indices = @transform_3, window_bounds = array<i64: 1, 8, 128>}, {pipeline_mode = #tpu.pipeline_mode<synchronous>, transform_indices = @transform_4, window_bounds = array<i64: 32, 16>}, {pipeline_mode = #tpu.pipeline_mode<synchronous>, transform_indices = @transform_5, window_bounds = array<i64: 32, 1>}, {transform_indices = @transform_6, window_bounds = array<i64: 1, 32, 128>}]} {
    %c0_i32 = arith.constant 0 : i32
    %0 = arith.cmpi eq, %arg2, %c0_i32 : i32
    %1 = arith.extui %0 : i1 to i32
    %c0_i32_0 = arith.constant 0 : i32
    %2 = arith.cmpi ne, %1, %c0_i32_0 : i32
    scf.if %2 {
      %cst_13 = arith.constant 0.000000e+00 : f32
      %67 = vector.broadcast %cst_13 : f32 to vector<16x128xf32>
      %c0_14 = arith.constant 0 : index
      %c0_15 = arith.constant 0 : index
      %68 = vector.load %arg10[%c0_14, %c0_15] : memref<16x128xf32, #tpu.memory_space<vmem>>, vector<16x128xf32>
      tpu.vector_store %arg10[%c0_14, %c0_15], %67 {strides = array<i32>} : memref<16x128xf32, #tpu.memory_space<vmem>>, vector<16x128xf32>,
    } else {
    }
    %c0 = arith.constant 0 : index
    %c0_1 = arith.constant 0 : index
    %c0_2 = arith.constant 0 : index
    %3 = vector.load %arg5[%c0, %c0_1, %c0_2] : memref<1x16x128xf32, #tpu.memory_space<vmem>>, vector<1x16x128xf32>
    %4 = vector.shape_cast %3 : vector<1x16x128xf32> to vector<16x128xf32>
    %c0_3 = arith.constant 0 : index
    %c0_4 = arith.constant 0 : index
    %c0_5 = arith.constant 0 : index
    %5 = vector.load %arg6[%c0_3, %c0_4, %c0_5] : memref<1x8x128xi32, #tpu.memory_space<vmem>>, vector<1x8x128xi32>
    %6 = vector.shape_cast %5 : vector<1x8x128xi32> to vector<8x128xi32>
    %c128_i32 = arith.constant 128 : i32
    %7 = arith.muli %arg2, %c128_i32 : i32
    %8 = vector.broadcast %7 : i32 to vector<8x128xi32>
    %9 = arith.subi %6, %8 : vector<8x128xi32>
    %10 = tpu.iota {dimensions = array<i32: 0>} : vector<128x128xi32>
    %cst = arith.constant 0.000000e+00 : f32
    %11 = vector.broadcast %cst : f32 to vector<128x128xf32>
    %12 = vector.extract_strided_slice %9 {offsets = [0, 0], sizes = [1, 128], strides = [1, 1]} : vector<8x128xi32> to vector<1x128xi32>
    %13 = vector.broadcast %12 : vector<1x128xi32> to vector<128x128xi32>
    %14 = arith.cmpi eq, %10, %13 : vector<128x128xi32>
    %15 = arith.extui %14 : vector<128x128xi1> to vector<128x128xi32>
    %16 = arith.sitofp %15 : vector<128x128xi32> to vector<128x128xf32>
    %17 = arith.addf %11, %16 : vector<128x128xf32>
    %18 = vector.extract_strided_slice %9 {offsets = [1, 0], sizes = [1, 128], strides = [1, 1]} : vector<8x128xi32> to vector<1x128xi32>
    %19 = vector.broadcast %18 : vector<1x128xi32> to vector<128x128xi32>
    %20 = arith.cmpi eq, %10, %19 : vector<128x128xi32>
    %21 = arith.extui %20 : vector<128x128xi1> to vector<128x128xi32>
    %22 = arith.sitofp %21 : vector<128x128xi32> to vector<128x128xf32>
    %23 = arith.addf %17, %22 : vector<128x128xf32>
    %24 = vector.extract_strided_slice %9 {offsets = [2, 0], sizes = [1, 128], strides = [1, 1]} : vector<8x128xi32> to vector<1x128xi32>
    %25 = vector.broadcast %24 : vector<1x128xi32> to vector<128x128xi32>
    %26 = arith.cmpi eq, %10, %25 : vector<128x128xi32>
    %27 = arith.extui %26 : vector<128x128xi1> to vector<128x128xi32>
    %28 = arith.sitofp %27 : vector<128x128xi32> to vector<128x128xf32>
    %29 = arith.addf %23, %28 : vector<128x128xf32>
    %30 = vector.extract_strided_slice %9 {offsets = [3, 0], sizes = [1, 128], strides = [1, 1]} : vector<8x128xi32> to vector<1x128xi32>
    %31 = vector.broadcast %30 : vector<1x128xi32> to vector<128x128xi32>
    %32 = arith.cmpi eq, %10, %31 : vector<128x128xi32>
    %33 = arith.extui %32 : vector<128x128xi1> to vector<128x128xi32>
    %34 = arith.sitofp %33 : vector<128x128xi32> to vector<128x128xf32>
    %35 = arith.addf %29, %34 : vector<128x128xf32>
    %36 = vector.extract_strided_slice %9 {offsets = [4, 0], sizes = [1, 128], strides = [1, 1]} : vector<8x128xi32> to vector<1x128xi32>
    %37 = vector.broadcast %36 : vector<1x128xi32> to vector<128x128xi32>
    %38 = arith.cmpi eq, %10, %37 : vector<128x128xi32>
    %39 = arith.extui %38 : vector<128x128xi1> to vector<128x128xi32>
    %40 = arith.sitofp %39 : vector<128x128xi32> to vector<128x128xf32>
    %41 = arith.addf %35, %40 : vector<128x128xf32>
    %42 = vector.extract_strided_slice %9 {offsets = [5, 0], sizes = [1, 128], strides = [1, 1]} : vector<8x128xi32> to vector<1x128xi32>
    %43 = vector.broadcast %42 : vector<1x128xi32> to vector<128x128xi32>
    %44 = arith.cmpi eq, %10, %43 : vector<128x128xi32>
    %45 = arith.extui %44 : vector<128x128xi1> to vector<128x128xi32>
    %46 = arith.sitofp %45 : vector<128x128xi32> to vector<128x128xf32>
    %47 = arith.addf %41, %46 : vector<128x128xf32>
    %48 = vector.extract_strided_slice %9 {offsets = [6, 0], sizes = [1, 128], strides = [1, 1]} : vector<8x128xi32> to vector<1x128xi32>
    %49 = vector.broadcast %48 : vector<1x128xi32> to vector<128x128xi32>
    %50 = arith.cmpi eq, %10, %49 : vector<128x128xi32>
    %51 = arith.extui %50 : vector<128x128xi1> to vector<128x128xi32>
    %52 = arith.sitofp %51 : vector<128x128xi32> to vector<128x128xf32>
    %53 = arith.addf %47, %52 : vector<128x128xf32>
    %54 = vector.extract_strided_slice %9 {offsets = [7, 0], sizes = [1, 128], strides = [1, 1]} : vector<8x128xi32> to vector<1x128xi32>
    %55 = vector.broadcast %54 : vector<1x128xi32> to vector<128x128xi32>
    %56 = arith.cmpi eq, %10, %55 : vector<128x128xi32>
    %57 = arith.extui %56 : vector<128x128xi1> to vector<128x128xi32>
    %58 = arith.sitofp %57 : vector<128x128xi32> to vector<128x128xf32>
    %59 = arith.addf %53, %58 : vector<128x128xf32>
    %c0_6 = arith.constant 0 : index
    %c0_7 = arith.constant 0 : index
    %60 = vector.load %arg10[%c0_6, %c0_7] : memref<16x128xf32, #tpu.memory_space<vmem>>, vector<16x128xf32>
    %cst_8 = arith.constant dense<0.000000e+00> : vector<16x128xf32>
    %61 = tpu.matmul %4, %59, %cst_8 {dimension_numbers = #tpu.dot_dimension_numbers<[1], [0], [0], [1], [0, 0, 1, 1], [], []>} : vector<16x128xf32>, vector<128x128xf32>, vector<16x128xf32> -> vector<16x128xf32>
    %62 = arith.addf %60, %61 : vector<16x128xf32>
    %c0_9 = arith.constant 0 : index
    %c0_10 = arith.constant 0 : index
    %63 = vector.load %arg10[%c0_9, %c0_10] : memref<16x128xf32, #tpu.memory_space<vmem>>, vector<16x128xf32>
    tpu.vector_store %arg10[%c0_9, %c0_10], %62 {strides = array<i32>} : memref<16x128xf32, #tpu.memory_space<vmem>>, vector<16x128xf32>,
    %c0_i32_11 = arith.constant 0 : i32
    %64 = arith.cmpi eq, %arg2, %c0_i32_11 : i32
    %65 = arith.extui %64 : i1 to i32
    %c0_i32_12 = arith.constant 0 : i32
    %66 = arith.cmpi ne, %65, %c0_i32_12 : i32
    scf.if %66 {
      %c0_13 = arith.constant 0 : index
      %67 = memref.load %arg3[%c0_13] : memref<1xf32, #tpu.memory_space<smem>>
      %c0_14 = arith.constant 0 : index
      %c0_15 = arith.constant 0 : index
      %c0_16 = arith.constant 0 : index
      %68 = vector.load %arg4[%c0_14, %c0_15, %c0_16] : memref<1x16x128xf32, #tpu.memory_space<vmem>>, vector<1x16x128xf32>
      %69 = vector.shape_cast %68 : vector<1x16x128xf32> to vector<16x128xf32>
      %cst_17 = arith.constant 1.000000e+00 : f32
      %70 = arith.addf %cst_17, %67 : f32
      %71 = vector.broadcast %70 : f32 to vector<16x128xf32>
      %72 = arith.mulf %71, %69 : vector<16x128xf32>
      %c0_18 = arith.constant 0 : index
      %c0_19 = arith.constant 0 : index
      %73 = vector.load %arg10[%c0_18, %c0_19] : memref<16x128xf32, #tpu.memory_space<vmem>>, vector<16x128xf32>
      %74 = arith.addf %72, %73 : vector<16x128xf32>
      %c0_20 = arith.constant 0 : index
      %c0_21 = arith.constant 0 : index
      %75 = vector.load %arg7[%c0_20, %c0_21] : memref<32x16xf32, #tpu.memory_space<vmem>>, vector<32x16xf32>
      %cst_22 = arith.constant dense<0.000000e+00> : vector<32x128xf32>
      %76 = tpu.matmul %75, %74, %cst_22 {dimension_numbers = #tpu.dot_dimension_numbers<[1], [0], [0], [1], [0, 0, 1, 1], [], []>} : vector<32x16xf32>, vector<16x128xf32>, vector<32x128xf32> -> vector<32x128xf32>
      %c0_23 = arith.constant 0 : index
      %c0_24 = arith.constant 0 : index
      %77 = vector.load %arg8[%c0_23, %c0_24] : memref<32x1xf32, #tpu.memory_space<vmem>>, vector<32x1xf32>
      %78 = vector.broadcast %77 : vector<32x1xf32> to vector<32x128xf32>
      %79 = arith.addf %76, %78 : vector<32x128xf32>
      %cst_25 = arith.constant 0.000000e+00 : f32
      %80 = vector.broadcast %cst_25 : f32 to vector<32x128xf32>
      %81 = arith.maximumf %79, %80 : vector<32x128xf32>
      %c0_26 = arith.constant 0 : index
      %c0_27 = arith.constant 0 : index
      %c0_28 = arith.constant 0 : index
      %82 = vector.load %arg9[%c0_26, %c0_27, %c0_28] : memref<1x32x128xf32, #tpu.memory_space<vmem>>, vector<1x32x128xf32>
      %83 = vector.shape_cast %82 : vector<1x32x128xf32> to vector<32x128xf32>
      %84 = vector.shape_cast %81 : vector<32x128xf32> to vector<1x32x128xf32>
      tpu.vector_store %arg9[%c0_26, %c0_27, %c0_28], %84 {strides = array<i32>} : memref<1x32x128xf32, #tpu.memory_space<vmem>>, vector<1x32x128xf32>,
    } else {
    }
    return
  }
  func.func @transform_0(%arg0: i32, %arg1: i32, %arg2: i32) -> i32 {
    %c0_i32 = arith.constant 0 : i32
    %c0_i32_0 = arith.constant 0 : i32
    return %c0_i32 : i32
  }
  func.func @transform_1(%arg0: i32, %arg1: i32, %arg2: i32) -> (i32, i32, i32) {
    %c0_i32 = arith.constant 0 : i32
    %c0_i32_0 = arith.constant 0 : i32
    return %arg0, %c0_i32, %arg1 : i32, i32, i32
  }
  func.func @transform_2(%arg0: i32, %arg1: i32, %arg2: i32) -> (i32, i32, i32) {
    %c0_i32 = arith.constant 0 : i32
    %c0_i32_0 = arith.constant 0 : i32
    return %arg0, %c0_i32, %arg2 : i32, i32, i32
  }
  func.func @transform_3(%arg0: i32, %arg1: i32, %arg2: i32) -> (i32, i32, i32) {
    %c0_i32 = arith.constant 0 : i32
    %c0_i32_0 = arith.constant 0 : i32
    return %arg0, %c0_i32, %arg1 : i32, i32, i32
  }
  func.func @transform_4(%arg0: i32, %arg1: i32, %arg2: i32) -> (i32, i32) {
    %c0_i32 = arith.constant 0 : i32
    %c0_i32_0 = arith.constant 0 : i32
    %c0_i32_1 = arith.constant 0 : i32
    return %c0_i32, %c0_i32_0 : i32, i32
  }
  func.func @transform_5(%arg0: i32, %arg1: i32, %arg2: i32) -> (i32, i32) {
    %c0_i32 = arith.constant 0 : i32
    %c0_i32_0 = arith.constant 0 : i32
    %c0_i32_1 = arith.constant 0 : i32
    return %c0_i32, %c0_i32_0 : i32, i32
  }
  func.func @transform_6(%arg0: i32, %arg1: i32, %arg2: i32) -> (i32, i32, i32) {
    %c0_i32 = arith.constant 0 : i32
    %c0_i32_0 = arith.constant 0 : i32
    return %arg0, %c0_i32, %arg1 : i32, i32, i32
  }
}

</mosaic_0001>

<bundles_post_ra>
// kernel: tpu_custom_call.1
= control target key start
LH: loop header
LB: loop body
LE: loop exit
PB: predicated region body
PF: predicated region fallthrough
CT: control target
= control target key end

     0   :  { %s2287_s0 = inlined_call_operand.<no memory space> [shape: f32[1], index: 0, kind: input, shape index: {}]   ;;  %s2288_s1 = inlined_call_operand.vmem [shape: f32[2,16,128], index: 1, kind: input, shape index: {}]   ;;  %s2289_s2 = inlined_call_operand.vmem [shape: f32[2,16,128], index: 2, kind: input, shape index: {}]   ;;  %s2290_s3 = inlined_call_operand.vmem [shape: s32[2,8,128], index: 3, kind: input, shape index: {}]   ;;  %s2291_s4 = inlined_call_operand.vmem [shape: f32[32,16], index: 4, kind: input, shape index: {}]   ;;  %s2292_s5 = inlined_call_operand.vmem [shape: f32[32,1], index: 5, kind: input, shape index: {}]   ;;  %s2293_s6 = inlined_call_operand.hbm [shape: f32[2,32,128], index: 6, kind: output, shape index: {}]  }
   0x1   :  { %11 = sst [smem:[#allocation3]] %s2287_s0 }
   0x2   :  { %12 = vsyncpa [#allocation5], 0 }
   0x3   :  { %14 = vsyncpa [#allocation5 + $0x1], 0  ;;  %s1675_s23 = smov 0   ;;  %s1677_s24 = smov 0  }
   0x4   :  { %s1679_s25 = smov 0   ;;  %s1681_s26 = smov 0  }
   0x5   :  { %s1683_s27 = smov 0   ;;  %s1685_s28 = smov 0  }
   0x6 LB: > { %s1273_s0 = sadd.s32 4294967295, %s1630_s28   ;;  %s1274_s29 = sadd.s32 4294967294, %s1630_s28   ;;  %s1630_s28 = sphi %s1685_s28, %s20_s28   ;;  %s1626_s27 = sphi %s1683_s27, %s2300_s27   ;;  %s1622_s26 = sphi %s1681_s26, %s2299_s26   ;;  %s1618_s25 = sphi %s1679_s25, %s2298_s25   ;;  %s1614_s24 = sphi %s1677_s24, %s2297_s24   ;;  %s1610_s23 = sphi %s1675_s23, %s2296_s23  }
   0x7   : > { %s39_s30 = sadd.s32 1, %s1626_s27  ;;  %s195_s7 = sadd.s32 1, %s1618_s25 }
   0x8   : > { %p41_p0 = scmp.ge.s32.totalorder %s39_s30, 2  ;;  %p205_p1 = scmp.ne.s32.totalorder %s1618_s25, %s1614_s24 }
   0x9   : > { %p206_p2 = scmp.eq.s32.totalorder %s1273_s0, 1  ;;  %p211_p3 = scmp.ne.s32.totalorder %s1614_s24, %s1610_s23 }
   0xa   : > { %s2302_s30 = smov (%p41_p0, %s39_s30), 0  ;;  %p212_p5 = scmp.eq.s32.totalorder %s1274_s29, 1 }
   0xb   : > { %p1715_p4 = por %p206_p2, %p205_p1  ;;  %s190_s9 = ssub.s32 %s1626_s27, %s2302_s30 }
   0xc   : > { %p1277_p6 = scmp.ge.s32.totalorder %s1630_s28, 1  ;;  %p193_p7 = scmp.eq.s32.totalorder %s190_s9, 0 }
   0xd   : > { %p1722_p8 = por %p212_p5, %p211_p3  ;;  %p271_p9 = scmp.lt.s32.totalorder %s1630_s28, 3 }
   0xe   : > { %s1728_s11 = scalar_select %p193_p7, %s1618_s25, %s195_s7  }
   0xf   : > { %p272_p10 = pnand %p1277_p6, %p271_p9 }
  0x10   : > { %p319_p11 = scmp.lt.s32.totalorder (!%p272_p10), %s1622_s26, 1  ;;  %s999_s18 = sld [smem:[#allocation3]] (!%p272_p10) }
  0x11   : > { %275 = sbr.rel (%p272_p10) target bundleno = 551 (0x227), region = 44  ;;  %s1634_s0 = smov (!%p272_p10), [#allocation4]  }
  0x12   : > { %s1558_s29 = sshll.u32 (!%p272_p10), %s1634_s0, 4  ;;  %s1559_s29 = int_to_ptr.vmem [resolvable:$false] %s1558_s29 }
  0x16   : > { %v354_v0 = vlaneseq  ;;  %s1732_s12 = scalar_select %p319_p11, %s1622_s26, 1  ;;  %v1632_v23 = vmov 0.0  }
  0x17   : > { %s1002_s19 = sadd.f32 1.0, %s999_s18  ;;  %s1423_s18 = sshll.u32 %s1622_s26, 9 }
  0x18   : > { %v1734_v1 = vshrl.u32 %v354_v0, 7  ;;  %s1283_s13 = sshll.u32 %s1732_s12, 3  ;;  %s1421_s14 = sshll.u32 %s1732_s12, 4 }
  0x19   : > { %s341_s17 = scalar_lea.vmem %s2290_s3, %s1283_s13  ;;  %s1761_s20 = scalar_lea.vmem %s2289_s2, %s1421_s14 }
  0x1a   : > { %v370_v2 = vadd.s32 120, %v1734_v1  ;;  %v373_v3 = vsub.s32 0, %v1734_v1  ;;  %v441_v4 = vsub.s32 1, %v1734_v1  ;;  %v509_v5 = vsub.s32 2, %v1734_v1  ;;  %v350_v10 = vld [vmem:[%s341_s17] sm:$0xff]  ;;  %s326_s22 = scalar_lea.vmem %s2288_s1, %s1421_s14  ;;  %s316_s13 = sand.u32 1, %s1614_s24  }
  0x1b   : > { %v577_v6 = vsub.s32 3, %v1734_v1  ;;  %v645_v7 = vsub.s32 4, %v1734_v1  ;;  %v713_v8 = vsub.s32 5, %v1734_v1  ;;  %v781_v9 = vsub.s32 6, %v1734_v1  ;;  %v348_v18 = vld [vmem:[%s1761_s20] sm:$0xff]  ;;  %s1278_s15 = sshll.u32 %s316_s13, 5  ;;  %s2240_s21 = scalar_lea.hbm %s2293_s6, %s1423_s18 }
  0x1c   : > { %v849_v11 = vsub.s32 7, %v1734_v1  ;;  %v1751_v12 = vadd.s32 112, %v1734_v1  ;;  %v1754_v13 = vadd.s32 104, %v1734_v1  ;;  %v1763_v14 = vrot.slane %v350_v10, %v373_v3  ;;  %1480 = vmatprep.mubr.f32.mxu0 %v348_v18  ;;  %s318_s16 = scalar_lea.vmem [#allocation4], %s1278_s15  ;;  %s1560_s12 = scalar_lea.vmem %s1559_s29, 1024 }
  0x1d   : > { %v1765_v15 = vrot.slane %v350_v10, %v441_v4  ;;  %v1767_v16 = vrot.slane %v350_v10, %v509_v5  ;;  %v1769_v17 = vrot.slane %v350_v10, %v577_v6  ;;  %v1772_v19 = vrot.slane %v350_v10, %v645_v7  ;;  %s1159_s17 = sshll.u32 %s318_s16, 4  ;;  %s2235_s17 = int_to_ptr.vmem [resolvable:$true] %s1159_s17 }
  0x1e   : > { %v1774_v20 = vrot.slane %v350_v10, %v713_v8  ;;  %v1776_v21 = vrot.slane %v350_v10, %v781_v9  ;;  %v1778_v22 = vrot.slane %v350_v10, %v849_v11  ;;  %vm390_vm0 = vcmp.eq.s32.totalorder %v370_v2, %v1763_v14  ;;  %s1554_s26 = scalar_lea.vmem %s2235_s17, 512  ;;  %p1561_p1 = scmp.lt.s32.totalorder %s2235_s17, %s1559_s29 }
  0x1f   : > { %vm458_vm1 = vcmp.eq.s32.totalorder %v370_v2, %v1765_v15  ;;  %vm526_vm2 = vcmp.eq.s32.totalorder %v370_v2, %v1767_v16  ;;  %vm594_vm3 = vcmp.eq.s32.totalorder %v370_v2, %v1769_v17  ;;  %v1299_v24 = vsel %vm390_vm0, 1.0, %v1632_v23  ;;  %p1555_p12 = scmp.ne.s32.totalorder %s2235_s17, %s1554_s26  ;;  %p1562_p2 = scmp.lt.s32.totalorder %s1560_s12, %s1554_s26 }
  0x20   : > { %v1315_v25 = vsel %vm458_vm1, 1.0, %v1632_v23  ;;  %v1331_v26 = vsel %vm526_vm2, 1.0, %v1632_v23  ;;  %v1788_v27 = vadd.s32 96, %v1734_v1  ;;  %vm662_vm4 = vcmp.eq.s32.totalorder %v370_v2, %v1772_v19 }
  0x21   : > { %v506_v28 = vadd.f32 %v1315_v25, %v1299_v24  ;;  %vm730_vm5 = vcmp.eq.s32.totalorder %v370_v2, %v1774_v20  ;;  %vm798_vm6 = vcmp.eq.s32.totalorder %v370_v2, %v1776_v21  ;;  %v1347_v29 = vsel %vm594_vm3, 1.0, %v1632_v23  ;;  %p1556_p13 = pnand %p1555_p12, %p1715_p4  ;;  %p1563_p3 = por %p1562_p2, %p1561_p1 }
  0x22   : > { %v1363_v30 = vsel %vm662_vm4, 1.0, %v1632_v23  ;;  %v1379_v31 = vsel %vm730_vm5, 1.0, %v1632_v23  ;;  %vm866_vm7 = vcmp.eq.s32.totalorder %v370_v2, %v1778_v22  ;;  %v1395_v33 = vsel %vm798_vm6, 1.0, %v1632_v23 }
  0x23   : > { %v574_v32 = vadd.f32 %v1331_v26, %v506_v28  ;;  %vm389_vm8 = vcmp.eq.s32.totalorder %v1751_v12, %v1763_v14  ;;  %vm457_vm9 = vcmp.eq.s32.totalorder %v1751_v12, %v1765_v15  ;;  %vm525_vm10 = vcmp.eq.s32.totalorder %v1751_v12, %v1767_v16  ;;  %p1557_p0 = pneg %p1556_p13 }
  0x24   : > { %v1298_v34 = vsel %vm389_vm8, 1.0, %v1632_v23  ;;  %v1314_v35 = vsel %vm457_vm9, 1.0, %v1632_v23  ;;  %vm593_vm11 = vcmp.eq.s32.totalorder %v1751_v12, %v1769_v17  ;;  %v1411_v37 = vsel %vm866_vm7, 1.0, %v1632_v23 }
  0x25   : > { %v642_v36 = vadd.f32 %v1347_v29, %v574_v32  ;;  %v505_v38 = vadd.f32 %v1314_v35, %v1298_v34  ;;  %v1330_v39 = vsel %vm525_vm10, 1.0, %v1632_v23  ;;  %v1346_v40 = vsel %vm593_vm11, 1.0, %v1632_v23  ;;  %p1564_p5 = pnand %p1563_p3, %p1557_p0 }
  0x26   : > { %vm661_vm12 = vcmp.eq.s32.totalorder %v1751_v12, %v1772_v19  ;;  %vm729_vm13 = vcmp.eq.s32.totalorder %v1751_v12, %v1774_v20  ;;  %vm797_vm14 = vcmp.eq.s32.totalorder %v1751_v12, %v1776_v21  ;;  %vm865_vm15 = vcmp.eq.s32.totalorder %v1751_v12, %v1778_v22 }
  0x27   : > { %v710_v41 = vadd.f32 %v1363_v30, %v642_v36  ;;  %v573_v42 = vadd.f32 %v1330_v39, %v505_v38  ;;  %v1362_v43 = vsel %vm661_vm12, 1.0, %v1632_v23  ;;  %v1378_v44 = vsel %vm729_vm13, 1.0, %v1632_v23 }
  0x28   : > { %v1394_v45 = vsel %vm797_vm14, 1.0, %v1632_v23  ;;  %vm388_vm0 = vcmp.eq.s32.totalorder %v1754_v13, %v1763_v14  ;;  %vm456_vm1 = vcmp.eq.s32.totalorder %v1754_v13, %v1765_v15  ;;  %vm524_vm2 = vcmp.eq.s32.totalorder %v1754_v13, %v1767_v16 }
  0x29   : > { %v778_v46 = vadd.f32 %v1379_v31, %v710_v41  ;;  %v641_v47 = vadd.f32 %v1346_v40, %v573_v42  ;;  %v1297_v48 = vsel %vm388_vm0, 1.0, %v1632_v23  ;;  %v1313_v49 = vsel %vm456_vm1, 1.0, %v1632_v23 }
  0x2a   : > { %v504_v50 = vadd.f32 %v1313_v49, %v1297_v48  ;;  %vm592_vm3 = vcmp.eq.s32.totalorder %v1754_v13, %v1769_v17  ;;  %vm660_vm4 = vcmp.eq.s32.totalorder %v1754_v13, %v1772_v19  ;;  %v1329_v53 = vsel %vm524_vm2, 1.0, %v1632_v23 }
  0x2b   : > { %v846_v51 = vadd.f32 %v1395_v33, %v778_v46  ;;  %v709_v52 = vadd.f32 %v1362_v43, %v641_v47  ;;  %v1345_v54 = vsel %vm592_vm3, 1.0, %v1632_v23  ;;  %v1410_v55 = vsel %vm865_vm15, 1.0, %v1632_v23 }
  0x2c   : > { %v572_v56 = vadd.f32 %v1329_v53, %v504_v50  ;;  %vm728_vm5 = vcmp.eq.s32.totalorder %v1754_v13, %v1774_v20  ;;  %vm796_vm6 = vcmp.eq.s32.totalorder %v1754_v13, %v1776_v21  ;;  %v1361_v59 = vsel %vm660_vm4, 1.0, %v1632_v23 }
  0x2d   : > { %v914_v57 = vadd.f32 %v1411_v37, %v846_v51  ;;  %v777_v58 = vadd.f32 %v1378_v44, %v709_v52  ;;  %v1377_v60 = vsel %vm728_vm5, 1.0, %v1632_v23  ;;  %v1393_v62 = vsel %vm796_vm6, 1.0, %v1632_v23 }
  0x2e   : > { %v640_v61 = vadd.f32 %v1345_v54, %v572_v56  ;;  %vm387_vm7 = vcmp.eq.s32.totalorder %v1788_v27, %v1763_v14  ;;  %vm455_vm8 = vcmp.eq.s32.totalorder %v1788_v27, %v1765_v15  ;;  %vm864_vm9 = vcmp.eq.s32.totalorder %v1754_v13, %v1778_v22 }
  0x2f   : > { %1448 = vmatprep.subr.mxu0 %v914_v57  ;;  %v845_v63 = vadd.f32 %v1394_v45, %v777_v58  ;;  %v1296_v0 = vsel %vm387_vm7, 1.0, %v1632_v23  ;;  %v1312_v2 = vsel %vm455_vm8, 1.0, %v1632_v23  ;;  %vm523_vm10 = vcmp.eq.s32.totalorder %v1788_v27, %v1767_v16 }
  0x30   : > { %1449 = vmatpush3.msra.mxu0 %v914_v57  ;;  %v708_v3 = vadd.f32 %v1361_v59, %v640_v61  ;;  %v503_v4 = vadd.f32 %v1312_v2, %v1296_v0  ;;  %vm591_vm11 = vcmp.eq.s32.totalorder %v1788_v27, %v1769_v17  ;;  %v1328_v6 = vsel %vm523_vm10, 1.0, %v1632_v23 }
  0x31   : > { %v913_v5 = vadd.f32 %v1410_v55, %v845_v63  ;;  %v1344_v7 = vsel %vm591_vm11, 1.0, %v1632_v23  ;;  %vm659_vm12 = vcmp.eq.s32.totalorder %v1788_v27, %v1772_v19  ;;  %vm727_vm13 = vcmp.eq.s32.totalorder %v1788_v27, %v1774_v20 }
  0x32   : > { %v776_v8 = vadd.f32 %v1377_v60, %v708_v3  ;;  %v571_v9 = vadd.f32 %v1328_v6, %v503_v4  ;;  %v1409_v10 = vsel %vm864_vm9, 1.0, %v1632_v23  ;;  %v1360_v11 = vsel %vm659_vm12, 1.0, %v1632_v23 }
  0x33   : > { %1450 = vmatprep.subr.mxu0 %v913_v5  ;;  %v1376_v12 = vsel %vm727_vm13, 1.0, %v1632_v23  ;;  %v366_v18 = vadd.s32 88, %v1734_v1  ;;  %vm795_vm14 = vcmp.eq.s32.totalorder %v1788_v27, %v1776_v21  ;;  %vm863_vm15 = vcmp.eq.s32.totalorder %v1788_v27, %v1778_v22 }
  0x34   : > { %1451 = vmatpush3.msra.mxu0 %v913_v5  ;;  %v844_v24 = vadd.f32 %v1393_v62, %v776_v8  ;;  %v639_v25 = vadd.f32 %v1344_v7, %v571_v9  ;;  %v1392_v30 = vsel %vm795_vm14, 1.0, %v1632_v23  ;;  %v1408_v35 = vsel %vm863_vm15, 1.0, %v1632_v23 }
  0x35   : > { %vm386_vm0 = vcmp.eq.s32.totalorder %v366_v18, %v1763_v14  ;;  %vm454_vm1 = vcmp.eq.s32.totalorder %v366_v18, %v1765_v15  ;;  %vm522_vm2 = vcmp.eq.s32.totalorder %v366_v18, %v1767_v16  ;;  %vm590_vm3 = vcmp.eq.s32.totalorder %v366_v18, %v1769_v17 }
  0x36   : > { %v912_v13 = vadd.f32 %v1409_v10, %v844_v24  ;;  %v707_v26 = vadd.f32 %v1360_v11, %v639_v25  ;;  %v1295_v28 = vsel %vm386_vm0, 1.0, %v1632_v23  ;;  %v1311_v29 = vsel %vm454_vm1, 1.0, %v1632_v23 }
  0x37   : > { %v502_v31 = vadd.f32 %v1311_v29, %v1295_v28  ;;  %v1327_v32 = vsel %vm522_vm2, 1.0, %v1632_v23  ;;  %vm658_vm4 = vcmp.eq.s32.totalorder %v366_v18, %v1772_v19  ;;  %v1343_v34 = vsel %vm590_vm3, 1.0, %v1632_v23 }
  0x38   : > { %1452 = vmatprep.subr.mxu0 %v912_v13  ;;  %v775_v33 = vadd.f32 %v1376_v12, %v707_v26  ;;  %vm726_vm5 = vcmp.eq.s32.totalorder %v366_v18, %v1774_v20  ;;  %vm794_vm6 = vcmp.eq.s32.totalorder %v366_v18, %v1776_v21  ;;  %v1359_v37 = vsel %vm658_vm4, 1.0, %v1632_v23 }
  0x39   : > { %1453 = vmatpush3.msra.mxu0 %v912_v13  ;;  %v570_v36 = vadd.f32 %v1327_v32, %v502_v31  ;;  %vm862_vm7 = vcmp.eq.s32.totalorder %v366_v18, %v1778_v22  ;;  %v1375_v39 = vsel %vm726_vm5, 1.0, %v1632_v23  ;;  %v1391_v40 = vsel %vm794_vm6, 1.0, %v1632_v23 }
  0x3a   : > { %v843_v38 = vadd.f32 %v1392_v30, %v775_v33  ;;  %v365_v41 = vadd.s32 80, %v1734_v1  ;;  %v1407_v43 = vsel %vm862_vm7, 1.0, %v1632_v23  ;;  %v1899_v44 = vadd.s32 72, %v1734_v1 }
  0x3b   : > { %v638_v42 = vadd.f32 %v1343_v34, %v570_v36  ;;  %v1902_v27 = vadd.s32 64, %v1734_v1  ;;  %v1915_v53 = vadd.s32 56, %v1734_v1  ;;  %v1918_v54 = vadd.s32 48, %v1734_v1 }
  0x3c   : > { %v911_v45 = vadd.f32 %v1408_v35, %v843_v38  ;;  %vm385_vm8 = vcmp.eq.s32.totalorder %v365_v41, %v1763_v14  ;;  %vm453_vm9 = vcmp.eq.s32.totalorder %v365_v41, %v1765_v15  ;;  %vm521_vm10 = vcmp.eq.s32.totalorder %v365_v41, %v1767_v16 }
  0x3d   : > { %v706_v46 = vadd.f32 %v1359_v37, %v638_v42  ;;  %v1294_v47 = vsel %vm385_vm8, 1.0, %v1632_v23  ;;  %v1310_v48 = vsel %vm453_vm9, 1.0, %v1632_v23  ;;  %v1326_v49 = vsel %vm521_vm10, 1.0, %v1632_v23 }
  0x3e   : > { %1454 = vmatprep.subr.mxu0 %v911_v45  ;;  %v501_v50 = vadd.f32 %v1310_v48, %v1294_v47  ;;  %vm589_vm11 = vcmp.eq.s32.totalorder %v365_v41, %v1769_v17  ;;  %vm657_vm12 = vcmp.eq.s32.totalorder %v365_v41, %v1772_v19  ;;  %vm725_vm13 = vcmp.eq.s32.totalorder %v365_v41, %v1774_v20 }
  0x3f   : > { %1455 = vmatpush3.msra.mxu0 %v911_v45  ;;  %v774_v51 = vadd.f32 %v1375_v39, %v706_v46  ;;  %v1342_v52 = vsel %vm589_vm11, 1.0, %v1632_v23  ;;  %v1358_v56 = vsel %vm657_vm12, 1.0, %v1632_v23  ;;  %vm793_vm14 = vcmp.eq.s32.totalorder %v365_v41, %v1776_v21 }
  0x40   : > { %v569_v55 = vadd.f32 %v1326_v49, %v501_v50  ;;  %vm384_vm15 = vcmp.eq.s32.totalorder %v1899_v44, %v1763_v14  ;;  %v1374_v58 = vsel %vm725_vm13, 1.0, %v1632_v23  ;;  %vm861_vm0 = vcmp.eq.s32.totalorder %v365_v41, %v1778_v22 }
  0x41   : > { %v842_v57 = vadd.f32 %v1391_v40, %v774_v51  ;;  %v1293_v59 = vsel %vm384_vm15, 1.0, %v1632_v23  ;;  %vm452_vm1 = vcmp.eq.s32.totalorder %v1899_v44, %v1765_v15  ;;  %vm520_vm2 = vcmp.eq.s32.totalorder %v1899_v44, %v1767_v16 }
  0x42   : > { %v637_v60 = vadd.f32 %v1342_v52, %v569_v55  ;;  %vm588_vm3 = vcmp.eq.s32.totalorder %v1899_v44, %v1769_v17  ;;  %v1390_v62 = vsel %vm793_vm14, 1.0, %v1632_v23  ;;  %v1309_v63 = vsel %vm452_vm1, 1.0, %v1632_v23 }
  0x43   : > { %v910_v61 = vadd.f32 %v1407_v43, %v842_v57  ;;  %v1325_v0 = vsel %vm520_vm2, 1.0, %v1632_v23  ;;  %v500_v3 = vadd.f32 %v1309_v63, %v1293_v59  ;;  %vm656_vm4 = vcmp.eq.s32.totalorder %v1899_v44, %v1772_v19 }
  0x44   : > { %v705_v2 = vadd.f32 %v1358_v56, %v637_v60  ;;  %vm724_vm5 = vcmp.eq.s32.totalorder %v1899_v44, %v1774_v20  ;;  %v1406_v4 = vsel %vm861_vm0, 1.0, %v1632_v23  ;;  %v1341_v5 = vsel %vm588_vm3, 1.0, %v1632_v23 }
  0x45   : > { %1456 = vmatprep.subr.mxu0 %v910_v61  ;;  %v1357_v6 = vsel %vm656_vm4, 1.0, %v1632_v23  ;;  %v1373_v7 = vsel %vm724_vm5, 1.0, %v1632_v23  ;;  %v568_v9 = vadd.f32 %v1325_v0, %v500_v3  ;;  %vm792_vm6 = vcmp.eq.s32.totalorder %v1899_v44, %v1776_v21 }
  0x46   : > { %1457 = vmatpush3.msra.mxu0 %v910_v61  ;;  %v773_v8 = vadd.f32 %v1374_v58, %v705_v2  ;;  %vm860_vm7 = vcmp.eq.s32.totalorder %v1899_v44, %v1778_v22  ;;  %vm383_vm8 = vcmp.eq.s32.totalorder %v1902_v27, %v1763_v14  ;;  %vm451_vm9 = vcmp.eq.s32.totalorder %v1902_v27, %v1765_v15 }
  0x47   : > { %vm519_vm10 = vcmp.eq.s32.totalorder %v1902_v27, %v1767_v16  ;;  %vm587_vm11 = vcmp.eq.s32.totalorder %v1902_v27, %v1769_v17  ;;  %v636_v11 = vadd.f32 %v1341_v5, %v568_v9  ;;  %v1292_v12 = vsel %vm383_vm8, 1.0, %v1632_v23 }
  0x48   : > { %v841_v10 = vadd.f32 %v1390_v62, %v773_v8  ;;  %v1308_v18 = vsel %vm451_vm9, 1.0, %v1632_v23  ;;  %v1389_v24 = vsel %vm792_vm6, 1.0, %v1632_v23  ;;  %v1324_v13 = vsel %vm519_vm10, 1.0, %v1632_v23 }
  0x49   : > { %v499_v25 = vadd.f32 %v1308_v18, %v1292_v12  ;;  %vm655_vm12 = vcmp.eq.s32.totalorder %v1902_v27, %v1772_v19  ;;  %v704_v28 = vadd.f32 %v1357_v6, %v636_v11  ;;  %v1340_v29 = vsel %vm587_vm11, 1.0, %v1632_v23 }
  0x4a   : > { %v909_v26 = vadd.f32 %v1406_v4, %v841_v10  ;;  %vm723_vm13 = vcmp.eq.s32.totalorder %v1902_v27, %v1774_v20  ;;  %v1405_v30 = vsel %vm860_vm7, 1.0, %v1632_v23  ;;  %v1356_v32 = vsel %vm655_vm12, 1.0, %v1632_v23 }
  0x4b   : > { %v567_v31 = vadd.f32 %v1324_v13, %v499_v25  ;;  %v1372_v33 = vsel %vm723_vm13, 1.0, %v1632_v23  ;;  %v772_v34 = vadd.f32 %v1373_v7, %v704_v28  ;;  %vm791_vm14 = vcmp.eq.s32.totalorder %v1902_v27, %v1776_v21 }
  0x4c   : > { %1458 = vmatprep.subr.mxu0 %v909_v26  ;;  %vm859_vm15 = vcmp.eq.s32.totalorder %v1902_v27, %v1778_v22  ;;  %vm382_vm0 = vcmp.eq.s32.totalorder %v1915_v53, %v1763_v14  ;;  %vm450_vm1 = vcmp.eq.s32.totalorder %v1915_v53, %v1765_v15  ;;  %vm518_vm2 = vcmp.eq.s32.totalorder %v1915_v53, %v1767_v16 }
  0x4d   : > { %1459 = vmatpush3.msra.mxu0 %v909_v26  ;;  %v635_v35 = vadd.f32 %v1340_v29, %v567_v31  ;;  %v1291_v36 = vsel %vm382_vm0, 1.0, %v1632_v23  ;;  %v840_v37 = vadd.f32 %v1389_v24, %v772_v34  ;;  %v1307_v38 = vsel %vm450_vm1, 1.0, %v1632_v23 }
  0x4e   : > { %v1323_v39 = vsel %vm518_vm2, 1.0, %v1632_v23  ;;  %vm586_vm3 = vcmp.eq.s32.totalorder %v1915_v53, %v1769_v17  ;;  %v1388_v41 = vsel %vm791_vm14, 1.0, %v1632_v23  ;;  %v498_v42 = vadd.f32 %v1307_v38, %v1291_v36 }
  0x4f   : > { %v703_v40 = vadd.f32 %v1356_v32, %v635_v35  ;;  %vm654_vm4 = vcmp.eq.s32.totalorder %v1915_v53, %v1772_v19  ;;  %v908_v43 = vadd.f32 %v1405_v30, %v840_v37  ;;  %v1404_v44 = vsel %vm859_vm15, 1.0, %v1632_v23 }
  0x50   : > { %v1339_v45 = vsel %vm586_vm3, 1.0, %v1632_v23  ;;  %vm722_vm5 = vcmp.eq.s32.totalorder %v1915_v53, %v1774_v20  ;;  %v566_v47 = vadd.f32 %v1323_v39, %v498_v42  ;;  %v1355_v48 = vsel %vm654_vm4, 1.0, %v1632_v23 }
  0x51   : > { %v771_v46 = vadd.f32 %v1372_v33, %v703_v40  ;;  %vm790_vm6 = vcmp.eq.s32.totalorder %v1915_v53, %v1776_v21  ;;  %1460 = vmatprep.subr.mxu0 %v908_v43  ;;  %v1371_v49 = vsel %vm722_vm5, 1.0, %v1632_v23  ;;  %vm381_vm7 = vcmp.eq.s32.totalorder %v1918_v54, %v1763_v14 }
  0x52   : > { %vm449_vm8 = vcmp.eq.s32.totalorder %v1918_v54, %v1765_v15  ;;  %vm517_vm9 = vcmp.eq.s32.totalorder %v1918_v54, %v1767_v16  ;;  %1461 = vmatpush3.msra.mxu0 %v908_v43  ;;  %v634_v50 = vadd.f32 %v1339_v45, %v566_v47  ;;  %vm858_vm10 = vcmp.eq.s32.totalorder %v1915_v53, %v1778_v22 }
  0x53   : > { %v839_v27 = vadd.f32 %v1388_v41, %v771_v46  ;;  %v1290_v51 = vsel %vm381_vm7, 1.0, %v1632_v23  ;;  %v1306_v52 = vsel %vm449_vm8, 1.0, %v1632_v23  ;;  %v1322_v55 = vsel %vm517_vm9, 1.0, %v1632_v23 }
  0x54   : > { %vm585_vm11 = vcmp.eq.s32.totalorder %v1918_v54, %v1769_v17  ;;  %vm653_vm12 = vcmp.eq.s32.totalorder %v1918_v54, %v1772_v19  ;;  %v702_v57 = vadd.f32 %v1355_v48, %v634_v50  ;;  %v1387_v58 = vsel %vm790_vm6, 1.0, %v1632_v23 }
  0x55   : > { %v907_v56 = vadd.f32 %v1404_v44, %v839_v27  ;;  %v497_v59 = vadd.f32 %v1306_v52, %v1290_v51  ;;  %v1338_v60 = vsel %vm585_vm11, 1.0, %v1632_v23  ;;  %vm721_vm13 = vcmp.eq.s32.totalorder %v1918_v54, %v1774_v20 }
  0x56   : > { %vm789_vm14 = vcmp.eq.s32.totalorder %v1918_v54, %v1776_v21  ;;  %vm857_vm15 = vcmp.eq.s32.totalorder %v1918_v54, %v1778_v22  ;;  %v770_v61 = vadd.f32 %v1371_v49, %v702_v57  ;;  %v1403_v62 = vsel %vm858_vm10, 1.0, %v1632_v23 }
  0x57   : > { %1462 = vmatprep.subr.mxu0 %v907_v56  ;;  %v565_v63 = vadd.f32 %v1322_v55, %v497_v59  ;;  %v1354_v0 = vsel %vm653_vm12, 1.0, %v1632_v23  ;;  %v1370_v2 = vsel %vm721_vm13, 1.0, %v1632_v23  ;;  %v1386_v3 = vsel %vm789_vm14, 1.0, %v1632_v23 }
  0x58   : > { %1463 = vmatpush3.msra.mxu0 %v907_v56  ;;  %v1402_v4 = vsel %vm857_vm15, 1.0, %v1632_v23  ;;  %v360_v5 = vadd.s32 40, %v1734_v1  ;;  %v838_v54 = vadd.f32 %v1387_v58, %v770_v61  ;;  %v2036_v7 = vadd.s32 32, %v1734_v1 }
  0x59   : > { %v633_v6 = vadd.f32 %v1338_v60, %v565_v63  ;;  %v2039_v53 = vadd.s32 24, %v1734_v1  ;;  %v2050_v24 = vadd.s32 16, %v1734_v1  ;;  %v2055_v26 = vadd.s32 8, %v1734_v1 }
  0x5a   : > { %vm380_vm0 = vcmp.eq.s32.totalorder %v360_v5, %v1763_v14  ;;  %vm448_vm1 = vcmp.eq.s32.totalorder %v360_v5, %v1765_v15  ;;  %vm516_vm2 = vcmp.eq.s32.totalorder %v360_v5, %v1767_v16  ;;  %vm584_vm3 = vcmp.eq.s32.totalorder %v360_v5, %v1769_v17 }
  0x5b   : > { %v906_v8 = vadd.f32 %v1403_v62, %v838_v54  ;;  %v701_v9 = vadd.f32 %v1354_v0, %v633_v6  ;;  %v1289_v10 = vsel %vm380_vm0, 1.0, %v1632_v23  ;;  %v1305_v11 = vsel %vm448_vm1, 1.0, %v1632_v23 }
  0x5c   : > { %v496_v12 = vadd.f32 %v1305_v11, %v1289_v10  ;;  %v1321_v18 = vsel %vm516_vm2, 1.0, %v1632_v23  ;;  %vm652_vm4 = vcmp.eq.s32.totalorder %v360_v5, %v1772_v19  ;;  %v1337_v13 = vsel %vm584_vm3, 1.0, %v1632_v23 }
  0x5d   : > { %1464 = vmatprep.subr.mxu0 %v906_v8  ;;  %v769_v25 = vadd.f32 %v1370_v2, %v701_v9  ;;  %vm720_vm5 = vcmp.eq.s32.totalorder %v360_v5, %v1774_v20  ;;  %v1353_v29 = vsel %vm652_vm4, 1.0, %v1632_v23  ;;  %vm788_vm6 = vcmp.eq.s32.totalorder %v360_v5, %v1776_v21 }
  0x5e   : > { %1465 = vmatpush3.msra.mxu0 %v906_v8  ;;  %v564_v28 = vadd.f32 %v1321_v18, %v496_v12  ;;  %v1369_v30 = vsel %vm720_vm5, 1.0, %v1632_v23  ;;  %vm856_vm7 = vcmp.eq.s32.totalorder %v360_v5, %v1778_v22  ;;  %vm379_vm8 = vcmp.eq.s32.totalorder %v2036_v7, %v1763_v14 }
  0x5f   : > { %v837_v31 = vadd.f32 %v1386_v3, %v769_v25  ;;  %vm447_vm9 = vcmp.eq.s32.totalorder %v2036_v7, %v1765_v15  ;;  %v1288_v33 = vsel %vm379_vm8, 1.0, %v1632_v23  ;;  %vm515_vm10 = vcmp.eq.s32.totalorder %v2036_v7, %v1767_v16 }
  0x60   : > { %v632_v32 = vadd.f32 %v1337_v13, %v564_v28  ;;  %v1304_v34 = vsel %vm447_vm9, 1.0, %v1632_v23  ;;  %v1320_v37 = vsel %vm515_vm10, 1.0, %v1632_v23  ;;  %vm583_vm11 = vcmp.eq.s32.totalorder %v2036_v7, %v1769_v17 }
  0x61   : > { %v905_v35 = vadd.f32 %v1402_v4, %v837_v31  ;;  %v495_v36 = vadd.f32 %v1304_v34, %v1288_v33  ;;  %v1336_v39 = vsel %vm583_vm11, 1.0, %v1632_v23  ;;  %vm651_vm12 = vcmp.eq.s32.totalorder %v2036_v7, %v1772_v19 }
  0x62   : > { %v700_v38 = vadd.f32 %v1353_v29, %v632_v32  ;;  %vm719_vm13 = vcmp.eq.s32.totalorder %v2036_v7, %v1774_v20  ;;  %v1385_v40 = vsel %vm788_vm6, 1.0, %v1632_v23  ;;  %v1401_v41 = vsel %vm856_vm7, 1.0, %v1632_v23 }
  0x63   : > { %1466 = vmatprep.subr.mxu0 %v905_v35  ;;  %v563_v42 = vadd.f32 %v1320_v37, %v495_v36  ;;  %v1352_v43 = vsel %vm651_vm12, 1.0, %v1632_v23  ;;  %v1368_v45 = vsel %vm719_vm13, 1.0, %v1632_v23  ;;  %vm787_vm14 = vcmp.eq.s32.totalorder %v2036_v7, %v1776_v21 }
  0x64   : > { %1467 = vmatpush3.msra.mxu0 %v905_v35  ;;  %v768_v44 = vadd.f32 %v1369_v30, %v700_v38  ;;  %vm378_vm15 = vcmp.eq.s32.totalorder %v2039_v53, %v1763_v14  ;;  %vm855_vm0 = vcmp.eq.s32.totalorder %v2036_v7, %v1778_v22  ;;  %vm446_vm1 = vcmp.eq.s32.totalorder %v2039_v53, %v1765_v15 }
  0x65   : > { %v631_v46 = vadd.f32 %v1336_v39, %v563_v42  ;;  %v1287_v47 = vsel %vm378_vm15, 1.0, %v1632_v23  ;;  %v1303_v49 = vsel %vm446_vm1, 1.0, %v1632_v23  ;;  %vm514_vm2 = vcmp.eq.s32.totalorder %v2039_v53, %v1767_v16 }
  0x66   : > { %v836_v48 = vadd.f32 %v1385_v40, %v768_v44  ;;  %vm582_vm3 = vcmp.eq.s32.totalorder %v2039_v53, %v1769_v17  ;;  %v1384_v50 = vsel %vm787_vm14, 1.0, %v1632_v23  ;;  %v494_v51 = vadd.f32 %v1303_v49, %v1287_v47 }
  0x67   : > { %v699_v27 = vadd.f32 %v1352_v43, %v631_v46  ;;  %v1319_v52 = vsel %vm514_vm2, 1.0, %v1632_v23  ;;  %v1335_v56 = vsel %vm582_vm3, 1.0, %v1632_v23  ;;  %vm650_vm4 = vcmp.eq.s32.totalorder %v2039_v53, %v1772_v19 }
  0x68   : > { %v904_v55 = vadd.f32 %v1401_v41, %v836_v48  ;;  %vm718_vm5 = vcmp.eq.s32.totalorder %v2039_v53, %v1774_v20  ;;  %v1400_v58 = vsel %vm855_vm0, 1.0, %v1632_v23  ;;  %v562_v59 = vadd.f32 %v1319_v52, %v494_v51 }
  0x69   : > { %v767_v57 = vadd.f32 %v1368_v45, %v699_v27  ;;  %vm786_vm6 = vcmp.eq.s32.totalorder %v2039_v53, %v1776_v21  ;;  %v1351_v60 = vsel %vm650_vm4, 1.0, %v1632_v23  ;;  %v1367_v61 = vsel %vm718_vm5, 1.0, %v1632_v23 }
  0x6a   : > { %1468 = vmatprep.subr.mxu0 %v904_v55  ;;  %vm377_vm7 = vcmp.eq.s32.totalorder %v2050_v24, %v1763_v14  ;;  %vm445_vm8 = vcmp.eq.s32.totalorder %v2050_v24, %v1765_v15  ;;  %v630_v63 = vadd.f32 %v1335_v56, %v562_v59  ;;  %vm854_vm9 = vcmp.eq.s32.totalorder %v2039_v53, %v1778_v22  ;;  %v349_v56 = vld [vmem:[%s1761_s20 + $0x8] sm:$0xff] }
  0x6b   : > { %1469 = vmatpush3.msra.mxu0 %v904_v55  ;;  %v835_v62 = vadd.f32 %v1384_v50, %v767_v57  ;;  %v1286_v0 = vsel %vm377_vm7, 1.0, %v1632_v23  ;;  %v1302_v2 = vsel %vm445_vm8, 1.0, %v1632_v23  ;;  %vm513_vm10 = vcmp.eq.s32.totalorder %v2050_v24, %v1767_v16  ;;  %v1015_v57 = vld [vmem:[%s2292_s5 + $0x8] sm:$0xff] }
  0x6c   : > { %vm581_vm11 = vcmp.eq.s32.totalorder %v2050_v24, %v1769_v17  ;;  %vm649_vm12 = vcmp.eq.s32.totalorder %v2050_v24, %v1772_v19  ;;  %v698_v4 = vadd.f32 %v1351_v60, %v630_v63  ;;  %v493_v5 = vadd.f32 %v1302_v2, %v1286_v0  ;;  %v1001_v59 = vld [vmem:[%s326_s22 + $0x8] sm:$0xff] }
  0x6d   : > { %v903_v3 = vadd.f32 %v1400_v58, %v835_v62  ;;  %v1318_v54 = vsel %vm513_vm10, 1.0, %v1632_v23  ;;  %v1383_v6 = vsel %vm786_vm6, 1.0, %v1632_v23  ;;  %v1399_v7 = vsel %vm854_vm9, 1.0, %v1632_v23  ;;  %v1017_v58 = vld [vmem:[%s2292_s5 + $0x18] sm:$0xff] }
  0x6e   : > { %v1334_v8 = vsel %vm581_vm11, 1.0, %v1632_v23  ;;  %vm717_vm13 = vcmp.eq.s32.totalorder %v2050_v24, %v1774_v20  ;;  %v766_v9 = vadd.f32 %v1367_v61, %v698_v4  ;;  %v561_v10 = vadd.f32 %v1318_v54, %v493_v5  ;;  %v1000_v61 = vld [vmem:[%s326_s22] sm:$0xff]  ;;  %v1011_v5 = vld [vmem:[%s2291_s4 + $0x8] sm:$0xff]  ;;  %v1012_v54 = vld [vmem:[%s2291_s4 + $0x10] sm:$0xff]  ;;  %s2242_s22 = scalar_lea.sflag [#allocation5], %s316_s13 }
  0x6f   : > { %1470 = vmatprep.subr.mxu0 %v903_v3  ;;  %v1350_v11 = vsel %vm649_vm12, 1.0, %v1632_v23  ;;  %vm785_vm14 = vcmp.eq.s32.totalorder %v2050_v24, %v1776_v21  ;;  %v1366_v12 = vsel %vm717_vm13, 1.0, %v1632_v23  ;;  %vm376_vm15 = vcmp.eq.s32.totalorder %v2055_v26, %v1763_v14 }
  0x70   : > { %1471 = vmatpush3.msra.mxu0 %v903_v3  ;;  %vm444_vm0 = vcmp.eq.s32.totalorder %v2055_v26, %v1765_v15  ;;  %vm512_vm1 = vcmp.eq.s32.totalorder %v2055_v26, %v1767_v16  ;;  %v834_v53 = vadd.f32 %v1383_v6, %v766_v9  ;;  %v629_v18 = vadd.f32 %v1334_v8, %v561_v10  ;;  %v1013_v6 = vld [vmem:[%s2291_s4 + $0x18] sm:$0xff] }
  0x71   : > { %vm853_vm2 = vcmp.eq.s32.totalorder %v2050_v24, %v1778_v22  ;;  %v1285_v25 = vsel %vm376_vm15, 1.0, %v1632_v23  ;;  %v1301_v13 = vsel %vm444_vm0, 1.0, %v1632_v23  ;;  %v1317_v28 = vsel %vm512_vm1, 1.0, %v1632_v23 }
  0x72   : > { %vm580_vm3 = vcmp.eq.s32.totalorder %v2055_v26, %v1769_v17  ;;  %vm648_vm4 = vcmp.eq.s32.totalorder %v2055_v26, %v1772_v19  ;;  %v902_v29 = vadd.f32 %v1399_v7, %v834_v53  ;;  %v697_v30 = vadd.f32 %v1350_v11, %v629_v18 }
  0x73   : > { %v492_v31 = vadd.f32 %v1301_v13, %v1285_v25  ;;  %v1382_v32 = vsel %vm785_vm14, 1.0, %v1632_v23  ;;  %v1398_v33 = vsel %vm853_vm2, 1.0, %v1632_v23  ;;  %v1333_v34 = vsel %vm580_vm3, 1.0, %v1632_v23 }
  0x74   : > { %vm716_vm5 = vcmp.eq.s32.totalorder %v2055_v26, %v1774_v20  ;;  %1472 = vmatprep.subr.mxu0 %v902_v29  ;;  %v765_v35 = vadd.f32 %v1366_v12, %v697_v30  ;;  %v1349_v37 = vsel %vm648_vm4, 1.0, %v1632_v23  ;;  %vm784_vm6 = vcmp.eq.s32.totalorder %v2055_v26, %v1776_v21 }
  0x75   : > { %v560_v36 = vadd.f32 %v1317_v28, %v492_v31  ;;  %1473 = vmatpush3.msra.mxu0 %v902_v29  ;;  %v1365_v38 = vsel %vm716_vm5, 1.0, %v1632_v23  ;;  %vm375_vm7 = vcmp.eq.s32.totalorder %v1734_v1, %v1763_v14  ;;  %vm443_vm8 = vcmp.eq.s32.totalorder %v1734_v1, %v1765_v15 }
  0x76   : > { %vm511_vm9 = vcmp.eq.s32.totalorder %v1734_v1, %v1767_v16  ;;  %v833_v24 = vadd.f32 %v1382_v32, %v765_v35  ;;  %v1284_v40 = vsel %vm375_vm7, 1.0, %v1632_v23  ;;  %v1300_v41 = vsel %vm443_vm8, 1.0, %v1632_v23 }
  0x77   : > { %v628_v39 = vadd.f32 %v1333_v34, %v560_v36  ;;  %v491_v42 = vadd.f32 %v1300_v41, %v1284_v40  ;;  %v1316_v43 = vsel %vm511_vm9, 1.0, %v1632_v23  ;;  %vm579_vm10 = vcmp.eq.s32.totalorder %v1734_v1, %v1769_v17 }
  0x78   : > { %vm647_vm11 = vcmp.eq.s32.totalorder %v1734_v1, %v1772_v19  ;;  %v901_v14 = vadd.f32 %v1398_v33, %v833_v24  ;;  %vm852_vm12 = vcmp.eq.s32.totalorder %v2055_v26, %v1778_v22  ;;  %v1332_v16 = vsel %vm579_vm10, 1.0, %v1632_v23 }
  0x79   : > { %v696_v15 = vadd.f32 %v1349_v37, %v628_v39  ;;  %v1381_v44 = vsel %vm784_vm6, 1.0, %v1632_v23  ;;  %v559_v45 = vadd.f32 %v1316_v43, %v491_v42  ;;  %vm715_vm13 = vcmp.eq.s32.totalorder %v1734_v1, %v1774_v20 }
  0x7a   : > { %1474 = vmatprep.subr.mxu0 %v901_v14  ;;  %v1348_v19 = vsel %vm647_vm11, 1.0, %v1632_v23  ;;  %v1397_v46 = vsel %vm852_vm12, 1.0, %v1632_v23  ;;  %vm783_vm14 = vcmp.eq.s32.totalorder %v1734_v1, %v1776_v21  ;;  %v1364_v26 = vsel %vm715_vm13, 1.0, %v1632_v23  ;;  %v1010_v21 = vld [vmem:[%s2291_s4] sm:$0xff] }
  0x7b   : > { %v764_v17 = vadd.f32 %v1365_v38, %v696_v15  ;;  %1475 = vmatpush3.msra.mxu0 %v901_v14  ;;  %v627_v47 = vadd.f32 %v1332_v16, %v559_v45  ;;  %vm851_vm15 = vcmp.eq.s32.totalorder %v1734_v1, %v1778_v22  ;;  %v1380_v27 = vsel %vm783_vm14, 1.0, %v1632_v23  ;;  %v1014_v1 = vld [vmem:[%s2292_s5] sm:$0xff]  ;;  %v1016_v22 = vld [vmem:[%s2292_s5 + $0x10] sm:$0xff] }
  0x7c   : > { %v1396_v51 = vsel %vm851_vm15, 1.0, %v1632_v23  ;;  %vm1038_vm0 = vcmask 130048   ;;  %v1633_v23 = vmov 0   ;;  %v1003_v60 = vstv %s1002_s19 }
  0x7d   : > { %v832_v48 = vadd.f32 %v1381_v44, %v764_v17  ;;  %v695_v49 = vadd.f32 %v1348_v19, %v627_v47  ;;  %1487 = vmatprep.mubr.msk.f32.mxu1 %vm1038_vm0, %v1010_v21  ;;  %1552 = vset.pattern.permute.xlu0 %v1633_v23  ;;  %v1005_v62 = vmul.f32 %v1003_v60, %v1001_v59 }
  0x7e   : > { %1553 = vset.pattern.permute.xlu1 %v1633_v23  ;;  %1020 = vperm.xlu0 %1552, %v1014_v1   ;;  %v1004_v63 = vmul.f32 %v1003_v60, %v1000_v61 }
  0x7f   : > { %v900_v20 = vadd.f32 %v1397_v46, %v832_v48  ;;  %v763_v50 = vadd.f32 %v1364_v26, %v695_v49  ;;  %1030 = vperm.xlu1 %1553, %v1016_v22  }
  0x81   : > { %1476 = vmatprep.subr.mxu0 %v900_v20  ;;  %v831_v52 = vadd.f32 %v1380_v27, %v763_v50 }
  0x82   : > { %1477 = vmatpush3.msra.mxu0 %v900_v20  ;;  %1025 = vperm.xlu0 %1552, %v1015_v57  }
  0x83   : > { %v899_v55 = vadd.f32 %v1396_v51, %v831_v52  ;;  %1035 = vperm.xlu1 %1553, %v1017_v58  }
  0x85   : > { %1478 = vmatprep.subr.mxu0 %v899_v55 }
  0x86   : > { %1479 = vmatpush3.msra.mxu0 %v899_v55 }
  0x87   : > { %1481 = vmatmul.mubr.f32.vlgmr.msra.gmra.mxu0 %v349_v56 }
  0xf9   : > { %v1021_v7 = vpop.permute.xlu0 %1020 }
  0xfa   : > { %v1031_v8 = vpop.permute.xlu1 %1030 }
  0xfd   : > { %v1026_v9 = vpop.permute.xlu0 %1025 }
  0xfe   : > { %v1036_v25 = vpop.permute.xlu1 %1035 }
 0x147   : > { %v1482_v0 = vpop.f32.mrf.mxu0 }
 0x148   : > { %v1009_v2 = vadd.f32 %v1482_v0, %v1005_v62 }
 0x149   : > { %v983_v3 = vpop.f32.mrf.mxu0 }
 0x14a   : > { %v1008_v4 = vadd.f32 %v1004_v63, %v983_v3  ;;  %1483 = vmatprep.subr.mxu1 %v1009_v2 }
 0x14b   : > { %1484 = vmatpush3.msra.mxu1 %v1009_v2 }
 0x14c   : > { %1485 = vmatprep.subr.mxu1 %v1008_v4 }
 0x14d   : > { %1486 = vmatpush3.msra.mxu1 %v1008_v4 }
 0x14e   : > { %1488 = vmatmul.mubr.msk.f32.vlgmr.msra.gmra.mxu1 %vm1038_vm0, %v1011_v5 }
 0x14f   : > { %1490 = vmatprep.mubr.msk.f32.mxu1 %vm1038_vm0, %v1012_v54 }
 0x152   : > { %1491 = vmatmul.mubr.msk.f32.gmra.mxu1 %vm1038_vm0, %v1013_v6 }
 0x20e   : > { %v1489_v10 = vpop.f32.mrf.mxu1 }
 0x20f   : > { %v1123_v11 = vadd.f32 %v1489_v10, %v1026_v9 }
 0x210   : > { %v1117_v12 = vpop.f32.mrf.mxu1 }
 0x211   : > { %v1137_v53 = vmax.f32 %v1123_v11, 0.0  ;;  %v1118_v18 = vadd.f32 %v1117_v12, %v1021_v7 }
 0x212   : > { %v1492_v13 = vpop.f32.mrf.mxu1 }
 0x213   : > { %1141 = vst [vmem:[%s318_s16 + $0x8] sm:$0xff] %v1137_v53  ;;  %v1136_v28 = vmax.f32 %v1118_v18, 0.0  ;;  %v1133_v29 = vadd.f32 %v1492_v13, %v1036_v25 }
 0x214   : > { %v1127_v30 = vpop.f32.mrf.mxu1 }
 0x215   : > { %1140 = vst [vmem:[%s318_s16] sm:$0xff] %v1136_v28  ;;  %v1139_v31 = vmax.f32 %v1133_v29, 0.0  ;;  %v1128_v32 = vadd.f32 %v1127_v30, %v1031_v8 }
 0x217   : > { %1143 = vst [vmem:[%s318_s16 + $0x18] sm:$0xff] %v1139_v31  ;;  %v1138_v33 = vmax.f32 %v1128_v32, 0.0 }
 0x219   : > { %1142 = vst [vmem:[%s318_s16 + $0x10] sm:$0xff] %v1138_v33 }
 0x21a   : > { %1567 = shalt.err (!%p1564_p5)
}
 0x21b   : > { %s1568_s7 = scalar_lea.hbm %s2240_s21, 512  ;;  %s1572_s13 = scalar_lea.hbm %s2293_s6, 1024 }
 0x21c   : > { %p1569_p6 = scmp.ne.s32.totalorder %s2240_s21, %s1568_s7  ;;  %p1573_p10 = scmp.lt.s32.totalorder %s2240_s21, %s2293_s6 }
 0x21d   : > { %p1574_p11 = scmp.lt.s32.totalorder %s1572_s13, %s1568_s7 }
 0x21e   : > { %p1570_p7 = pnand %p1569_p6, %p1715_p4 }
 0x21f   : > { %p1575_p12 = por %p1574_p11, %p1573_p10 }
 0x220   : > { %p1571_p9 = pneg %p1570_p7 }
 0x222   : > { %p1576_p13 = pnand %p1575_p12, %p1571_p9 }
 0x224   : > { %1579 = shalt.err (!%p1576_p13)
}
 0x225   : > { %s1635_s18 = smov 128   ;;  %s1636_s19 = smov 8  }
 0x226   : > { %1493 = dma.vmem_to_hbm [thread:$0]  (%p1715_p4), %s2235_s17, 512, %s2240_s21, %s2242_s22, %s1635_s18, %s1635_s18, %s1636_s19  }
 0x227 PF: > { %p1499_p0 = scmp.ge.s32.totalorder %s1630_s28, 2  ;;  %s1174_s20 = sand.u32 1, %s1610_s23  }
 0x228   : > { %s1175_s26 = scalar_lea.sflag [#allocation5], %s1174_s20 }
 0x229   : > { %p1496_p1 = pnand %p1499_p0, %p1722_p8 }
 0x22b   : > { %p1497_p2 = pneg %p1496_p1 }
 0x22d   : > { %1605 = dma.done.wait (%p1497_p2), %s1175_s26, 512  }
 0x22e   : > { %1607 = vsyncadd (%p1497_p2), %s1175_s26, 4294966784  ;;  %s20_s28 = sadd.s32 1, %s1630_s28   ;;  %s2296_s23 = smov %s1614_s24 }
 0x22f   : > { %p17_p3 = scmp.ge.s32.totalorder %s20_s28, 4   ;;  %s2297_s24 = smov %s1618_s25 }
 0x230   : > { %s2298_s25 = smov %s1728_s11  ;;  %s2299_s26 = smov %s1626_s27 }
 0x231   : > { %s2300_s27 = smov %s2302_s30  ;;  %19 = sbr.rel (!%p17_p3) target bundleno = 6 (0x6), region = 93 }
 0x236   :  { %1180 = vsyncpa [#allocation5], 1 }
 0x237   :  { %1182 = vsyncpa [#allocation5 + $0x1], 1 }

</bundles_post_ra>
